<compile_context>
chip_gen: v7x
topology: tpu7x:2x2x1
jax: 0.10.0
libtpu: 0.0.40
codegen_flags: <defaults>
</compile_context>

<pallas_src>
import functools
import math

import jax
import jax.numpy as jnp
from jax import lax
from jax.experimental import pallas as pl
from jax.experimental.pallas import tpu as pltpu

ALPHA = 1.0
GAMMA = 2.0
NUM_BINS = 10
AGE_RANGE = (0.0, 100.0)

LANES = 128          # TPU vreg lane width: last dim of every tile
MAX_TILE_ROWS = 512  # 512 x 128 f32 = 256 KiB per input tile buffer


def _round_up(x, m):
    return ((x + m - 1) // m) * m


def focal_loss_kernel(preds_ref, out_ref, *, alpha, gamma, num_bins, n_valid,
                      tile_rows, tiles_per_chunk):
    """One (tile_rows, 128) tile of predictions -> per-lane partial focal sums."""
    p = pl.program_id(0)   # outer chunk  ('parallel'  -> megacore sharding on v7x)
    t = pl.program_id(1)   # inner tile   ('arbitrary' -> reduction axis)

    @pl.when(t == 0)
    def _init():
        out_ref[...] = jnp.zeros_like(out_ref)

    x = preds_ref[...]     # (tile_rows, 128) f32, lane-dense

    # Per-row cross-entropy WITHOUT materializing (N, num_bins): every logit
    # column equals x, so logsumexp = x + log(num_bins) and logits[target] = x
    # for any bucketized target.
    ce = (x + jnp.float32(math.log(num_bins))) - x   # == log(num_bins) up to rounding

    # pt = exp(-ce) == 1/num_bins, so the focal weight is a compile-time scalar;
    # folding it removes the per-element EUP exp and the float pow (exp+log).
    focal_w = float(alpha) * (1.0 - 1.0 / float(num_bins)) ** float(gamma)
    focal = jnp.float32(focal_w) * ce                # (tile_rows, 128)

    # Mask out padded tail elements (flat element index >= true N).
    base = (p * tiles_per_chunk + t) * (tile_rows * LANES)
    row = lax.broadcasted_iota(jnp.int32, (tile_rows, LANES), 0)
    lane = lax.broadcasted_iota(jnp.int32, (tile_rows, LANES), 1)
    flat = base + row * LANES + lane
    focal = jnp.where(flat < n_valid, focal, 0.0)

    # Sublane-reduce the tile into a lane-dense (1, 128) partial sum and
    # accumulate it in this chunk's output block (VMEM-resident across 't').
    out_ref[...] += jnp.sum(focal, axis=0, keepdims=True)


def focal_loss(predictions, targets, *, alpha=ALPHA, gamma=GAMMA,
               num_bins=NUM_BINS, age_range=AGE_RANGE, tile_rows=None):
    """JAX wrapper matching FocalLoss.forward(predictions, targets)."""
    # `targets` only feed torch.bucketize, whose result selects among identical
    # logit columns and therefore cannot affect the loss -> not streamed.
    # `age_range` likewise only defines the (unused) bin boundaries.
    del targets, age_range

    preds = jnp.asarray(predictions, jnp.float32).reshape(-1)
    n = int(preds.shape[0])

    # Lane-dense layout: pad to a whole number of (tile_rows, 128) tiles.
    rows = pl.cdiv(n, LANES)
    if tile_rows is None:
        tile_rows = min(MAX_TILE_ROWS, _round_up(rows, 8))
    tile_rows = max(8, _round_up(int(tile_rows), 8))

    tiles_total = pl.cdiv(rows, tile_rows)
    p_chunks = 2 if tiles_total >= 2 else 1        # feed both TensorCores on v7x
    t_tiles = pl.cdiv(tiles_total, p_chunks)
    padded_rows = p_chunks * t_tiles * tile_rows
    padded_n = padded_rows * LANES

    preds2d = jnp.pad(preds, (0, padded_n - n)).reshape(padded_rows, LANES)
    # TODO(synk): optionally stream predictions as bf16 to halve HBM bytes on
    # this DMA-bound kernel (kept f32 here to mirror the reference numerics).

    kernel = functools.partial(
        focal_loss_kernel,
        alpha=float(alpha), gamma=float(gamma), num_bins=int(num_bins),
        n_valid=n, tile_rows=int(tile_rows), tiles_per_chunk=int(t_tiles))

    partials = pl.pallas_call(
        kernel,
        out_shape=jax.ShapeDtypeStruct((p_chunks, LANES), jnp.float32),
        grid=(p_chunks, t_tiles),
        in_specs=[pl.BlockSpec((tile_rows, LANES),
                               lambda p, t: (p * t_tiles + t, 0))],
        out_specs=pl.BlockSpec((1, LANES), lambda p, t: (p, 0)),
        compiler_params=pltpu.CompilerParams(
            dimension_semantics=("parallel", "arbitrary"),
            vmem_limit_bytes=32 * 1024 * 1024,
        ),
    )(preds2d)

    # Finalize: tiny cross-lane / cross-chunk reduction, divide by the TRUE N.
    return jnp.sum(partials) / jnp.float32(n)


def _reference(predictions, targets, *, alpha=ALPHA, gamma=GAMMA,
               num_bins=NUM_BINS, age_range=AGE_RANGE):
    """Pure-JAX mirror of the PyTorch forward (full CE path), for correctness."""
    age_bins = jnp.linspace(age_range[0], age_range[1], num_bins + 1, dtype=jnp.float32)
    boundaries = age_bins[1:-1]
    t = targets.reshape(-1).astype(jnp.float32)
    binned = jnp.searchsorted(boundaries, t, side="left")   # torch.bucketize(right=False)
    logits = jnp.broadcast_to(predictions.reshape(-1, 1).astype(jnp.float32),
                              (t.shape[0], num_bins))
    lse = jax.nn.logsumexp(logits, axis=1)
    logit_t = jnp.take_along_axis(logits, binned[:, None], axis=1)[:, 0]
    ce = lse - logit_t
    pt = jnp.exp(-ce)
    return jnp.mean(alpha * (1.0 - pt) ** gamma * ce)


if __name__ == "__main__":
    key = jax.random.PRNGKey(0)
    k1, k2, k3, k4 = jax.random.split(key, 4)

    # Small case consistent with the module (regression head: (N, 1) preds, (N,) ages).
    N = 16
    predictions = jax.random.uniform(k1, (N, 1), jnp.float32, 0.0, 100.0)
    targets = jax.random.uniform(k2, (N,), jnp.float32, 0.0, 100.0)
    loss = jax.block_until_ready(focal_loss(predictions, targets))
    ref = _reference(predictions, targets)
    assert jnp.allclose(loss, ref, rtol=1e-5, atol=1e-5), (loss, ref)

    # Ragged case exercising padding/masking, multi-tile accumulation and the
    # 2-chunk 'parallel' axis (both TensorCores on v7x).
    N2 = 4103
    predictions2 = jax.random.uniform(k3, (N2, 1), jnp.float32, 0.0, 100.0)
    targets2 = jax.random.uniform(k4, (N2,), jnp.float32, 0.0, 100.0)
    loss2 = jax.block_until_ready(focal_loss(predictions2, targets2, tile_rows=8))
    ref2 = _reference(predictions2, targets2)
    assert jnp.allclose(loss2, ref2, rtol=1e-5, atol=1e-5), (loss2, ref2)

    print("KERNEL_OK")
</pallas_src>

<mosaic_0001>
module attributes {stable_mosaic.version = 11 : i64} {
  func.func @focal_loss_kernel(%arg0: i32, %arg1: i32, %arg2: memref<8x128xf32, #tpu.memory_space<vmem>>, %arg3: memref<1x128xf32, #tpu.memory_space<vmem>>) attributes {dimension_semantics = [#tpu.dimension_semantics<parallel>, #tpu.dimension_semantics<arbitrary>], iteration_bounds = array<i64: 1, 1>, scalar_prefetch = 0 : i64, scratch_operands = 0 : i64, tpu.core_type = #tpu.core_type<tc>, window_params = [{transform_indices = @transform_0, window_bounds = array<i64: 8, 128>}, {transform_indices = @transform_1, window_bounds = array<i64: 1, 128>}]} {
    %c0_i32 = arith.constant 0 : i32
    %0 = arith.cmpi eq, %arg1, %c0_i32 : i32
    %1 = arith.extui %0 : i1 to i32
    %c0_i32_0 = arith.constant 0 : i32
    %2 = arith.cmpi ne, %1, %c0_i32_0 : i32
    scf.if %2 {
      %cst_9 = arith.constant 0.000000e+00 : f32
      %28 = vector.broadcast %cst_9 : f32 to vector<1x128xf32>
      %c0_10 = arith.constant 0 : index
      %c0_11 = arith.constant 0 : index
      %29 = vector.load %arg3[%c0_10, %c0_11] : memref<1x128xf32, #tpu.memory_space<vmem>>, vector<1x128xf32>
      tpu.vector_store %arg3[%c0_10, %c0_11], %28 {strides = array<i32>} : memref<1x128xf32, #tpu.memory_space<vmem>>, vector<1x128xf32>,
    } else {
    }
    %c0 = arith.constant 0 : index
    %c0_1 = arith.constant 0 : index
    %3 = vector.load %arg2[%c0, %c0_1] : memref<8x128xf32, #tpu.memory_space<vmem>>, vector<8x128xf32>
    %cst = arith.constant 2.30258512 : f32
    %4 = vector.broadcast %cst : f32 to vector<8x128xf32>
    %5 = arith.addf %3, %4 : vector<8x128xf32>
    %6 = arith.subf %5, %3 : vector<8x128xf32>
    %cst_2 = arith.constant 8.100000e-01 : f32
    %7 = vector.broadcast %cst_2 : f32 to vector<8x128xf32>
    %8 = arith.mulf %7, %6 : vector<8x128xf32>
    %c1_i32 = arith.constant 1 : i32
    %9 = arith.muli %arg0, %c1_i32 : i32
    %10 = arith.addi %9, %arg1 : i32
    %c1024_i32 = arith.constant 1024 : i32
    %11 = arith.muli %10, %c1024_i32 : i32
    %12 = tpu.iota {dimensions = array<i32: 0>} : vector<8x128xi32>
    %13 = tpu.iota {dimensions = array<i32: 1>} : vector<8x128xi32>
    %c128_i32 = arith.constant 128 : i32
    %14 = vector.broadcast %c128_i32 : i32 to vector<8x128xi32>
    %15 = arith.muli %12, %14 : vector<8x128xi32>
    %16 = vector.broadcast %11 : i32 to vector<8x128xi32>
    %17 = arith.addi %16, %15 : vector<8x128xi32>
    %18 = arith.addi %17, %13 : vector<8x128xi32>
    %c16_i32 = arith.constant 16 : i32
    %19 = vector.broadcast %c16_i32 : i32 to vector<8x128xi32>
    %20 = arith.cmpi slt, %18, %19 : vector<8x128xi32>
    %cst_3 = arith.constant 0.000000e+00 : f32
    %21 = vector.broadcast %cst_3 : f32 to vector<8x128xf32>
    %22 = arith.select %20, %8, %21 : vector<8x128xi1>, vector<8x128xf32>
    %c0_4 = arith.constant 0 : index
    %c0_5 = arith.constant 0 : index
    %23 = vector.load %arg3[%c0_4, %c0_5] : memref<1x128xf32, #tpu.memory_space<vmem>>, vector<1x128xf32>
    %cst_6 = arith.constant dense<0.000000e+00> : vector<128xf32>
    %24 = vector.multi_reduction <add>, %22, %cst_6 [0] : vector<8x128xf32> to vector<128xf32>
    %25 = vector.shape_cast %24 : vector<128xf32> to vector<1x128xf32>
    %26 = arith.addf %23, %25 : vector<1x128xf32>
    %c0_7 = arith.constant 0 : index
    %c0_8 = arith.constant 0 : index
    %27 = vector.load %arg3[%c0_7, %c0_8] : memref<1x128xf32, #tpu.memory_space<vmem>>, vector<1x128xf32>
    tpu.vector_store %arg3[%c0_7, %c0_8], %26 {strides = array<i32>} : memref<1x128xf32, #tpu.memory_space<vmem>>, vector<1x128xf32>,
    return
  }
  func.func @transform_0(%arg0: i32, %arg1: i32) -> (i32, i32) {
    %c1_i32 = arith.constant 1 : i32
    %0 = arith.muli %arg0, %c1_i32 : i32
    %1 = arith.addi %0, %arg1 : i32
    %c0_i32 = arith.constant 0 : i32
    %c0_i32_0 = arith.constant 0 : i32
    return %1, %c0_i32 : i32, i32
  }
  func.func @transform_1(%arg0: i32, %arg1: i32) -> (i32, i32) {
    %c0_i32 = arith.constant 0 : i32
    %c0_i32_0 = arith.constant 0 : i32
    return %arg0, %c0_i32 : i32, i32
  }
}

</mosaic_0001>

<bundles_post_ra>
// kernel: tpu_custom_call.1
= control target key start
LH: loop header
LB: loop body
LE: loop exit
PB: predicated region body
PF: predicated region fallthrough
CT: control target
= control target key end

     0   :  { %6 = vsyncpa [#allocation3], 0  ;;  %s158_s0 = inlined_call_operand.hbm [shape: f32[8,128], index: 0, kind: input, shape index: {}]   ;;  %s159_s1 = inlined_call_operand.hbm [shape: f32[1,128], index: 1, kind: output, shape index: {}]  }
   0x1   :  { %7 = vsyncpa [#allocation4], 0  ;;  %s121_s6 = smov [#allocation2]   ;;  %s73_s10 = scalar_lea.hbm %s158_s0, 128 }
   0x2   :  { %s17_s7 = sshll.u32 %s121_s6, 4  ;;  %p74_p0 = scmp.ne.s32.totalorder %s158_s0, %s73_s10  ;;  %s18_s7 = int_to_ptr.vmem [resolvable:$true] %s17_s7 }
   0x3   :  { %p77_p1 = scmp.lt.u32.totalorder %s73_s10, %s158_s0 }
   0x5   :  { %p79_p2 = pnand %p77_p1, %p74_p0 }
   0x7   :  { %82 = shalt.err (!%p79_p2)
}
   0x8   :  { %s83_s15 = scalar_lea.vmem %s18_s7, 128  ;;  %p88_p4 = scmp.lt.s32.totalorder %s18_s7, %s18_s7 }
   0x9   :  { %p84_p3 = scmp.ne.s32.totalorder %s18_s7, %s83_s15  ;;  %p89_p5 = scmp.lt.s32.totalorder %s83_s15, %s83_s15 }
   0xb   :  { %p90_p6 = por %p89_p5, %p88_p4 }
   0xd   :  { %p91_p7 = pnand %p90_p6, %p84_p3 }
   0xf   :  { %94 = shalt.err (!%p91_p7)
}
  0x10   :  { %20 = dma.hbm_to_vmem [thread:$0]  %s158_s0, 128, %s18_s7, [#allocation3]  }
  0x11   :  { %117 = dma.done.wait [#allocation3], 128  }
  0x12   :  { %118 = vsyncadd [#allocation3], 4294967168  ;;  %v36_v0 = vlaneseq  ;;  %v122_v1 = vmov 0.0   ;;  %v30_v5 = vld [vmem:[#allocation2] sm:$0xff]  ;;  %s123_s0 = smov [#allocation5]  }
  0x13   :  { %29 = vst [vmem:[#allocation5] sm:$0x1] %v122_v1  ;;  %v31_v7 = vadd.f32 2.3025851, %v30_v5  ;;  %s61_s18 = sshll.u32 %s123_s0, 4  ;;  %s62_s18 = int_to_ptr.vmem [resolvable:$true] %s61_s18 }
  0x14   :  { %v37_v2 = vshrl.u32 %v36_v0, 7  ;;  %v39_v3 = vand.u32 127, %v36_v0  ;;  %s95_s19 = scalar_lea.vmem %s62_s18, 16  ;;  %s99_s20 = scalar_lea.vmem %s62_s18, 32 }
  0x15   :  { %v32_v8 = vsub.f32 %v31_v7, %v30_v5  ;;  %p96_p8 = scmp.ne.s32.totalorder %s62_s18, %s95_s19  ;;  %p100_p9 = scmp.lt.s32.totalorder %s62_s18, %s62_s18 }
  0x16   :  { %v40_v4 = vmul.u32 128, %v37_v2  ;;  %p101_p10 = scmp.lt.s32.totalorder %s99_s20, %s95_s19 }
  0x17   :  { %v33_v9 = vmul.f32 0.81, %v32_v8 }
  0x18   :  { %v43_v6 = vadd.s32 %v40_v4, %v39_v3  ;;  %p102_p11 = por %p101_p10, %p100_p9 }
  0x1a   :  { %vm44_vm0 = vcmp.lt.s32.totalorder %v43_v6, 16  ;;  %v46_v16 = vld [vmem:[#allocation5] sm:$0x1]  ;;  %p103_p12 = pnand %p102_p11, %p96_p8 }
  0x1b   :  { %v45_v10 = vsel %vm44_vm0, %v33_v9, 0.0 }
  0x1c   :  { %v47_v11 = vrot.slane %v45_v10, 4 }
  0x1e   :  { %v48_v12 = vadd.f32 %v47_v11, %v45_v10 }
  0x20   :  { %v49_v13 = vrot.slane %v48_v12, 2 }
  0x22   :  { %v50_v14 = vadd.f32 %v49_v13, %v48_v12 }
  0x24   :  { %v51_v15 = vrot.slane %v50_v14, 1 }
  0x26   :  { %v52_v17 = vadd.f32 %v51_v15, %v50_v14 }
  0x28   :  { %v53_v18 = vadd.f32 %v52_v17, %v46_v16 }
  0x2a   :  { %54 = vst [vmem:[#allocation5] sm:$0x1] %v53_v18 }
  0x2b   :  { %106 = shalt.err (!%p103_p12)
}
  0x2c   :  { %s107_s23 = scalar_lea.hbm %s159_s1, 16 }
  0x2d   :  { %p108_p13 = scmp.ne.s32.totalorder %s159_s1, %s107_s23  ;;  %p111_p0 = scmp.lt.u32.totalorder %s107_s23, %s159_s1 }
  0x2f   :  { %p113_p1 = pnand %p111_p0, %p108_p13 }
  0x31   :  { %116 = shalt.err (!%p113_p1)
}
  0x32   :  { %64 = dma.vmem_to_hbm [thread:$0]  %s62_s18, 16, %s159_s1, [#allocation4]  }
  0x33   :  { %119 = dma.done.wait [#allocation4], 16  }
  0x34   :  { %120 = vsyncadd [#allocation4], 4294967280 }
  0x35   :  { %68 = vsyncpa [#allocation3], 1 }
  0x36   :  { %69 = vsyncpa [#allocation4], 1 }

</bundles_post_ra>
